<compile_context>
chip_gen: v7x
topology: tpu7x:2x2x1
jax: 0.10.0
libtpu: 0.0.40
codegen_flags: <defaults>
</compile_context>

<pallas_src>
import jax
import jax.numpy as jnp
from jax import lax
from jax.experimental import pallas as pl
from jax.experimental.pallas import tpu as pltpu


# ---------------------------------------------------------------------------
# Pallas kernel
# ---------------------------------------------------------------------------
def _spp_kernel(w_ref, b_ref,                  # SMEM: (Cin,), (1,)
                x_ref,                         # VMEM: (1, Cin, TR, W)      full-res row tile
                p2_ref, p3_ref, p4_ref,        # VMEM: (1, Cin, hp_k, wp_k) pooled maps
                kh2_ref, kh3_ref, kh4_ref,     # VMEM: (TR, hp_k)  row-interp rows of this tile
                kw2_ref, kw3_ref, kw4_ref,     # VMEM: (wp_k, W)   column-interp (transposed)
                o_ref):                        # VMEM: (1, Cin + 4, TR, W)
    cin = x_ref.shape[1]
    bias = b_ref[0]
    odt = o_ref.dtype

    def conv1x1(ref):
        # 1x1 conv over the Cin channels of a (1, Cin, A, B) block -> (A, B) f32.
        # Every term is a full (A, B) 2-D tile (all sublanes used); weights are SMEM
        # scalars broadcast by the VPU; pairwise tree keeps the add chain short.
        # TODO(synk): for large Cin (e.g. 512) this unrolled loop should become an
        # MXU dot over a channel-flattened view instead of Cin scalar FMAs.
        terms = [ref[0, c].astype(jnp.float32) * w_ref[c] for c in range(cin)]
        while len(terms) > 1:
            nxt = [terms[i] + terms[i + 1] for i in range(0, len(terms) - 1, 2)]
            if len(terms) % 2:
                nxt.append(terms[-1])
            terms = nxt
        return terms[0] + bias

    # Branch 1: pool(k=1, s=1) and a same-size bilinear resize are identities -> conv(x).
    o_ref[0, 0, :, :] = conv1x1(x_ref).astype(odt)

    # Branches 2-4: conv the tiny pooled map, then separable bilinear upsample:
    #   up_tile(TR, W) = Kh_tile(TR, hp) @ [ S(hp, wp) @ KwT(wp, W) ]
    def pooled_branch(p_ref, kh_ref, kw_ref, ch):
        s = conv1x1(p_ref)                                        # (hp, wp) f32
        t = jnp.dot(s, kw_ref[...],
                    preferred_element_type=jnp.float32)           # (hp, W)  column interp
        up = jnp.dot(kh_ref[...], t,
                     preferred_element_type=jnp.float32)          # (TR, W)  row interp
        o_ref[0, ch, :, :] = up.astype(odt)

    pooled_branch(p2_ref, kh2_ref, kw2_ref, 1)
    pooled_branch(p3_ref, kh3_ref, kw3_ref, 2)
    pooled_branch(p4_ref, kh4_ref, kw4_ref, 3)

    # Channel copy of x: straight through, no dtype round-trip.
    o_ref[0, 4:4 + cin, :, :] = x_ref[0]


# ---------------------------------------------------------------------------
# Plain-JAX helpers (tiny precomputation)
# ---------------------------------------------------------------------------
def _maxpool_nchw(x, k):
    # PyTorch MaxPool2d(kernel=k, stride=k, ceil_mode=False) == VALID reduce_window.
    return lax.reduce_window(x, -jnp.inf, lax.max,
                             window_dimensions=(1, 1, k, k),
                             window_strides=(1, 1, k, k),
                             padding="VALID")


def _linear_interp_matrix(out_size, in_size):
    # 1-D linear interpolation matrix, half-pixel centers
    # (== PyTorch bilinear upsample with align_corners=False).
    if in_size == out_size:
        return jnp.eye(out_size, dtype=jnp.float32)
    scale = in_size / out_size
    dst = jnp.arange(out_size, dtype=jnp.float32)
    src = jnp.clip((dst + 0.5) * scale - 0.5, 0.0, float(in_size - 1))
    lo = jnp.floor(src).astype(jnp.int32)
    hi = jnp.minimum(lo + 1, in_size - 1)
    frac = src - lo.astype(jnp.float32)
    rows = jnp.arange(out_size)
    mat = jnp.zeros((out_size, in_size), dtype=jnp.float32)
    mat = mat.at[rows, lo].add(1.0 - frac)
    mat = mat.at[rows, hi].add(frac)
    return mat


def _round_up(v, m):
    return (v + m - 1) // m * m


def _choose_tile_rows(H, W, cin, cout, itemsize, max_pixels, vmem_budget, want_split):
    """Largest whole-row tile height TR such that
       * TR divides H (no partially valid tiles),
       * TR is sublane-legal for the (TR, hp) Kh block (TR % 8 == 0 or TR == H),
       * the double-buffered x/out blocks stay inside the VMEM budget and pixel cap."""
    lane_w = _round_up(W, 128)                        # VMEM lane padding of the last dim
    per_row = (cin + cout) * lane_w * itemsize * 2    # x + out blocks, double-buffered
    max_rows = max(1, min(max_pixels // max(W, 1), vmem_budget // per_row))
    cands = [tr for tr in range(H, 0, -1)
             if H % tr == 0 and (tr % 8 == 0 or tr == H)]
    fit = [tr for tr in cands if tr <= max_rows]
    pool = fit if fit else [cands[-1]]                # fall back to the smallest legal tile
    if want_split:                                    # N == 1: keep both v7x TensorCores busy
        split = [tr for tr in pool if tr < H]
        if split:
            return split[0]
    return pool[0]


# ---------------------------------------------------------------------------
# Wrapper
# ---------------------------------------------------------------------------
def sppblock_pallas(x, weight, bias, *,
                    max_pixels_per_block=8192,
                    vmem_block_budget_bytes=12 * 1024 * 1024):
    """SPPblock forward.

    x      : (N, Cin, H, W)
    weight : (Cin,)  -- Conv2d(Cin, 1, kernel_size=1) weight, squeezed from (1,Cin,1,1)
    bias   : (1,)
    returns: (N, Cin + 4, H, W) == concat([4 conv/upsample branches, x], channels)
    """
    N, Cin, H, W = x.shape
    if H < 6 or W < 6:
        raise ValueError("SPPblock requires H >= 6 and W >= 6 (k=6 VALID max-pool).")
    Cout = Cin + 4
    HW = H * W
    isz = jnp.dtype(x.dtype).itemsize

    # ---- max-pool stages (tiny outputs). k=6 reuses the k=3 pool: for VALID
    # stride=k pooling, maxpool2(maxpool3(x)) == maxpool6(x) exactly, so x is read
    # from HBM twice for pooling + once by the kernel (instead of 4x).
    # TODO(synk): the reduce_window pooling itself is not fused into the Pallas kernel.
    p2 = _maxpool_nchw(x, 2)
    p3 = _maxpool_nchw(x, 3)
    p4 = _maxpool_nchw(p3, 2)                 # == _maxpool_nchw(x, 6)

    hp2, wp2 = p2.shape[2], p2.shape[3]
    hp3, wp3 = p3.shape[2], p3.shape[3]
    hp4, wp4 = p4.shape[2], p4.shape[3]

    # Separable bilinear (align_corners=False) interpolation matrices: O(H*hp + W*wp).
    kh2 = _linear_interp_matrix(H, hp2); kw2t = _linear_interp_matrix(W, wp2).T
    kh3 = _linear_interp_matrix(H, hp3); kw3t = _linear_interp_matrix(W, wp3).T
    kh4 = _linear_interp_matrix(H, hp4); kw4t = _linear_interp_matrix(W, wp4).T

    w_s = weight.reshape(Cin).astype(jnp.float32)     # SMEM scalars
    b_s = bias.reshape(1).astype(jnp.float32)

    # ---- whole-row tiles: TR divides H, so there is never a partially valid tile,
    # each tile needs exactly one (TR, hp) Kh slab, and the (TR, W) results store
    # directly with no in-kernel reshape.
    tr = _choose_tile_rows(H, W, Cin, Cout, isz,
                           max_pixels_per_block, vmem_block_budget_bytes,
                           want_split=(N == 1))
    num_tiles = H // tr
    grid = (num_tiles, N)   # batch innermost: Kh row-slabs are fetched once per row tile

    smem = pl.BlockSpec(memory_space=pltpu.MemorySpace.SMEM)
    in_specs = [
        smem,                                                         # weight
        smem,                                                         # bias
        pl.BlockSpec((1, Cin, tr, W), lambda t, n: (n, 0, t, 0)),     # x row tile
        pl.BlockSpec((1, Cin, hp2, wp2), lambda t, n: (n, 0, 0, 0)),  # pooled k=2
        pl.BlockSpec((1, Cin, hp3, wp3), lambda t, n: (n, 0, 0, 0)),  # pooled k=3
        pl.BlockSpec((1, Cin, hp4, wp4), lambda t, n: (n, 0, 0, 0)),  # pooled k=6
        pl.BlockSpec((tr, hp2), lambda t, n: (t, 0)),                 # Kh rows, k=2
        pl.BlockSpec((tr, hp3), lambda t, n: (t, 0)),                 # Kh rows, k=3
        pl.BlockSpec((tr, hp4), lambda t, n: (t, 0)),                 # Kh rows, k=6
        pl.BlockSpec((wp2, W), lambda t, n: (0, 0)),                  # KwT, k=2
        pl.BlockSpec((wp3, W), lambda t, n: (0, 0)),                  # KwT, k=3
        pl.BlockSpec((wp4, W), lambda t, n: (0, 0)),                  # KwT, k=6
    ]
    out_spec = pl.BlockSpec((1, Cout, tr, W), lambda t, n: (n, 0, t, 0))

    # Advisory cost estimate so XLA schedules the pooling prologue and this call sanely.
    pks = (hp2 * wp2, hp3 * wp3, hp4 * wp4)
    hps = (hp2, hp3, hp4)
    wps = (wp2, wp3, wp4)
    flops = (2 * N * Cin * HW
             + 2 * N * num_tiles * (Cin + W) * sum(pks)   # pooled convs + column interp
             + 2 * N * H * W * sum(hps))                  # row interp
    bytes_accessed = (N * HW * (Cin + Cout) * isz
                      + N * num_tiles * Cin * sum(pks) * isz
                      + 4 * (H * sum(hps) + W * sum(wps)))
    cost = pl.CostEstimate(flops=int(flops), transcendentals=0,
                           bytes_accessed=int(bytes_accessed))

    out = pl.pallas_call(
        _spp_kernel,
        out_shape=jax.ShapeDtypeStruct((N, Cout, H, W), x.dtype),
        grid_spec=pltpu.PrefetchScalarGridSpec(
            num_scalar_prefetch=0,
            grid=grid,
            in_specs=in_specs,
            out_specs=out_spec,
        ),
        compiler_params=pltpu.CompilerParams(
            dimension_semantics=("parallel", "parallel"),
            vmem_limit_bytes=32 * 1024 * 1024,
        ),
        cost_estimate=cost,
    )(w_s, b_s, x, p2, p3, p4, kh2, kh3, kh4, kw2t, kw3t, kw4t)

    return out


# ---------------------------------------------------------------------------
# Plain-JAX reference (independent of the kernel's separable formulation:
# uses the direct k=6 pool and a full einsum upsample at HIGHEST precision).
# ---------------------------------------------------------------------------
def sppblock_reference(x, weight, bias):
    N, Cin, H, W = x.shape

    def conv1x1(t):
        return (t * weight[None, :, None, None]).sum(axis=1, keepdims=True) + bias[0]

    def upsample(t):  # bilinear, align_corners=False
        h, w = t.shape[2], t.shape[3]
        ah = _linear_interp_matrix(H, h)
        aw = _linear_interp_matrix(W, w)
        return jnp.einsum("Hh,nchw,Ww->ncHW", ah, t, aw,
                          precision=jax.lax.Precision.HIGHEST)

    l1 = conv1x1(x)  # pool1 (k=1,s=1) and same-size bilinear resize are identities
    l2 = upsample(conv1x1(_maxpool_nchw(x, 2)))
    l3 = upsample(conv1x1(_maxpool_nchw(x, 3)))
    l4 = upsample(conv1x1(_maxpool_nchw(x, 6)))
    return jnp.concatenate([l1, l2, l3, l4, x], axis=1)


if __name__ == "__main__":
    N, Cin, H, W = 2, 4, 16, 16

    key = jax.random.PRNGKey(0)
    kx, kw, kb = jax.random.split(key, 3)
    x = jax.random.normal(kx, (N, Cin, H, W), dtype=jnp.float32)
    weight = jax.random.normal(kw, (Cin,), dtype=jnp.float32) * 0.1   # Conv2d(Cin,1,1) weight
    bias = jax.random.normal(kb, (1,), dtype=jnp.float32) * 0.1

    y = sppblock_pallas(x, weight, bias)
    jax.block_until_ready(y)

    y_ref = sppblock_reference(x, weight, bias)
    assert y.shape == (N, Cin + 4, H, W), y.shape

    # Channel 0 (full-res conv) and channels 4.. (copy of x) never touch the MXU.
    assert jnp.allclose(y[:, 0], y_ref[:, 0], atol=1e-5, rtol=1e-5), \
        float(jnp.max(jnp.abs(y[:, 0] - y_ref[:, 0])))
    assert jnp.allclose(y[:, 4:], y_ref[:, 4:], atol=1e-5, rtol=1e-5), \
        float(jnp.max(jnp.abs(y[:, 4:] - y_ref[:, 4:])))
    # Channels 1..3 go through the two small MXU interp matmuls (default precision);
    # tolerance covers any reduced-precision MXU pass.
    assert jnp.allclose(y[:, 1:4], y_ref[:, 1:4], atol=5e-3, rtol=5e-3), \
        float(jnp.max(jnp.abs(y[:, 1:4] - y_ref[:, 1:4])))

    print("KERNEL_OK")
</pallas_src>

<mosaic_0001>
module attributes {stable_mosaic.version = 11 : i64} {
  func.func @_spp_kernel(%arg0: i32, %arg1: i32, %arg2: memref<4xf32, #tpu.memory_space<smem>>, %arg3: memref<1xf32, #tpu.memory_space<smem>>, %arg4: memref<1x4x16x16xf32, #tpu.memory_space<vmem>>, %arg5: memref<1x4x8x8xf32, #tpu.memory_space<vmem>>, %arg6: memref<1x4x5x5xf32, #tpu.memory_space<vmem>>, %arg7: memref<1x4x2x2xf32, #tpu.memory_space<vmem>>, %arg8: memref<16x8xf32, #tpu.memory_space<vmem>>, %arg9: memref<16x5xf32, #tpu.memory_space<vmem>>, %arg10: memref<16x2xf32, #tpu.memory_space<vmem>>, %arg11: memref<8x16xf32, #tpu.memory_space<vmem>>, %arg12: memref<5x16xf32, #tpu.memory_space<vmem>>, %arg13: memref<2x16xf32, #tpu.memory_space<vmem>>, %arg14: memref<1x8x16x16xf32, #tpu.memory_space<vmem>>) attributes {dimension_semantics = [#tpu.dimension_semantics<parallel>, #tpu.dimension_semantics<parallel>], iteration_bounds = array<i64: 1, 2>, scalar_prefetch = 0 : i64, scratch_operands = 0 : i64, tpu.core_type = #tpu.core_type<tc>, window_params = [{transform_indices = @transform_0, window_bounds = array<i64: 4>}, {transform_indices = @transform_1, window_bounds = array<i64: 1>}, {transform_indices = @transform_2, window_bounds = array<i64: 1, 4, 16, 16>}, {transform_indices = @transform_3, window_bounds = array<i64: 1, 4, 8, 8>}, {transform_indices = @transform_4, window_bounds = array<i64: 1, 4, 5, 5>}, {transform_indices = @transform_5, window_bounds = array<i64: 1, 4, 2, 2>}, {transform_indices = @transform_6, window_bounds = array<i64: 16, 8>}, {transform_indices = @transform_7, window_bounds = array<i64: 16, 5>}, {transform_indices = @transform_8, window_bounds = array<i64: 16, 2>}, {pipeline_mode = #tpu.pipeline_mode<synchronous>, transform_indices = @transform_9, window_bounds = array<i64: 8, 16>}, {pipeline_mode = #tpu.pipeline_mode<synchronous>, transform_indices = @transform_10, window_bounds = array<i64: 5, 16>}, {pipeline_mode = #tpu.pipeline_mode<synchronous>, transform_indices = @transform_11, window_bounds = array<i64: 2, 16>}, {transform_indices = @transform_12, window_bounds = array<i64: 1, 8, 16, 16>}]} {
    %c0 = arith.constant 0 : index
    %0 = memref.load %arg3[%c0] : memref<1xf32, #tpu.memory_space<smem>>
    %c0_0 = arith.constant 0 : index
    %c0_1 = arith.constant 0 : index
    %c0_2 = arith.constant 0 : index
    %c0_3 = arith.constant 0 : index
    %1 = vector.load %arg4[%c0_0, %c0_1, %c0_2, %c0_3] : memref<1x4x16x16xf32, #tpu.memory_space<vmem>>, vector<1x1x16x16xf32>
    %2 = vector.shape_cast %1 : vector<1x1x16x16xf32> to vector<16x16xf32>
    %c0_4 = arith.constant 0 : index
    %3 = memref.load %arg2[%c0_4] : memref<4xf32, #tpu.memory_space<smem>>
    %4 = vector.broadcast %3 : f32 to vector<16x16xf32>
    %5 = arith.mulf %2, %4 : vector<16x16xf32>
    %c0_5 = arith.constant 0 : index
    %c1 = arith.constant 1 : index
    %c0_6 = arith.constant 0 : index
    %c0_7 = arith.constant 0 : index
    %6 = vector.load %arg4[%c0_5, %c1, %c0_6, %c0_7] : memref<1x4x16x16xf32, #tpu.memory_space<vmem>>, vector<1x1x16x16xf32>
    %7 = vector.shape_cast %6 : vector<1x1x16x16xf32> to vector<16x16xf32>
    %c1_8 = arith.constant 1 : index
    %8 = memref.load %arg2[%c1_8] : memref<4xf32, #tpu.memory_space<smem>>
    %9 = vector.broadcast %8 : f32 to vector<16x16xf32>
    %10 = arith.mulf %7, %9 : vector<16x16xf32>
    %c0_9 = arith.constant 0 : index
    %c2 = arith.constant 2 : index
    %c0_10 = arith.constant 0 : index
    %c0_11 = arith.constant 0 : index
    %11 = vector.load %arg4[%c0_9, %c2, %c0_10, %c0_11] : memref<1x4x16x16xf32, #tpu.memory_space<vmem>>, vector<1x1x16x16xf32>
    %12 = vector.shape_cast %11 : vector<1x1x16x16xf32> to vector<16x16xf32>
    %c2_12 = arith.constant 2 : index
    %13 = memref.load %arg2[%c2_12] : memref<4xf32, #tpu.memory_space<smem>>
    %14 = vector.broadcast %13 : f32 to vector<16x16xf32>
    %15 = arith.mulf %12, %14 : vector<16x16xf32>
    %c0_13 = arith.constant 0 : index
    %c3 = arith.constant 3 : index
    %c0_14 = arith.constant 0 : index
    %c0_15 = arith.constant 0 : index
    %16 = vector.load %arg4[%c0_13, %c3, %c0_14, %c0_15] : memref<1x4x16x16xf32, #tpu.memory_space<vmem>>, vector<1x1x16x16xf32>
    %17 = vector.shape_cast %16 : vector<1x1x16x16xf32> to vector<16x16xf32>
    %c3_16 = arith.constant 3 : index
    %18 = memref.load %arg2[%c3_16] : memref<4xf32, #tpu.memory_space<smem>>
    %19 = vector.broadcast %18 : f32 to vector<16x16xf32>
    %20 = arith.mulf %17, %19 : vector<16x16xf32>
    %21 = arith.addf %5, %10 : vector<16x16xf32>
    %22 = arith.addf %15, %20 : vector<16x16xf32>
    %23 = arith.addf %21, %22 : vector<16x16xf32>
    %24 = vector.broadcast %0 : f32 to vector<16x16xf32>
    %25 = arith.addf %23, %24 : vector<16x16xf32>
    %c0_17 = arith.constant 0 : index
    %c0_18 = arith.constant 0 : index
    %c0_19 = arith.constant 0 : index
    %c0_20 = arith.constant 0 : index
    %26 = vector.load %arg14[%c0_17, %c0_18, %c0_19, %c0_20] : memref<1x8x16x16xf32, #tpu.memory_space<vmem>>, vector<1x1x16x16xf32>
    %27 = vector.shape_cast %26 : vector<1x1x16x16xf32> to vector<16x16xf32>
    %28 = vector.shape_cast %25 : vector<16x16xf32> to vector<1x1x16x16xf32>
    tpu.vector_store %arg14[%c0_17, %c0_18, %c0_19, %c0_20], %28 {strides = array<i32>} : memref<1x8x16x16xf32, #tpu.memory_space<vmem>>, vector<1x1x16x16xf32>,
    %c0_21 = arith.constant 0 : index
    %c0_22 = arith.constant 0 : index
    %c0_23 = arith.constant 0 : index
    %c0_24 = arith.constant 0 : index
    %29 = vector.load %arg5[%c0_21, %c0_22, %c0_23, %c0_24] : memref<1x4x8x8xf32, #tpu.memory_space<vmem>>, vector<1x1x8x8xf32>
    %30 = vector.shape_cast %29 : vector<1x1x8x8xf32> to vector<8x8xf32>
    %c0_25 = arith.constant 0 : index
    %31 = memref.load %arg2[%c0_25] : memref<4xf32, #tpu.memory_space<smem>>
    %32 = vector.broadcast %31 : f32 to vector<8x8xf32>
    %33 = arith.mulf %30, %32 : vector<8x8xf32>
    %c0_26 = arith.constant 0 : index
    %c1_27 = arith.constant 1 : index
    %c0_28 = arith.constant 0 : index
    %c0_29 = arith.constant 0 : index
    %34 = vector.load %arg5[%c0_26, %c1_27, %c0_28, %c0_29] : memref<1x4x8x8xf32, #tpu.memory_space<vmem>>, vector<1x1x8x8xf32>
    %35 = vector.shape_cast %34 : vector<1x1x8x8xf32> to vector<8x8xf32>
    %c1_30 = arith.constant 1 : index
    %36 = memref.load %arg2[%c1_30] : memref<4xf32, #tpu.memory_space<smem>>
    %37 = vector.broadcast %36 : f32 to vector<8x8xf32>
    %38 = arith.mulf %35, %37 : vector<8x8xf32>
    %c0_31 = arith.constant 0 : index
    %c2_32 = arith.constant 2 : index
    %c0_33 = arith.constant 0 : index
    %c0_34 = arith.constant 0 : index
    %39 = vector.load %arg5[%c0_31, %c2_32, %c0_33, %c0_34] : memref<1x4x8x8xf32, #tpu.memory_space<vmem>>, vector<1x1x8x8xf32>
    %40 = vector.shape_cast %39 : vector<1x1x8x8xf32> to vector<8x8xf32>
    %c2_35 = arith.constant 2 : index
    %41 = memref.load %arg2[%c2_35] : memref<4xf32, #tpu.memory_space<smem>>
    %42 = vector.broadcast %41 : f32 to vector<8x8xf32>
    %43 = arith.mulf %40, %42 : vector<8x8xf32>
    %c0_36 = arith.constant 0 : index
    %c3_37 = arith.constant 3 : index
    %c0_38 = arith.constant 0 : index
    %c0_39 = arith.constant 0 : index
    %44 = vector.load %arg5[%c0_36, %c3_37, %c0_38, %c0_39] : memref<1x4x8x8xf32, #tpu.memory_space<vmem>>, vector<1x1x8x8xf32>
    %45 = vector.shape_cast %44 : vector<1x1x8x8xf32> to vector<8x8xf32>
    %c3_40 = arith.constant 3 : index
    %46 = memref.load %arg2[%c3_40] : memref<4xf32, #tpu.memory_space<smem>>
    %47 = vector.broadcast %46 : f32 to vector<8x8xf32>
    %48 = arith.mulf %45, %47 : vector<8x8xf32>
    %49 = arith.addf %33, %38 : vector<8x8xf32>
    %50 = arith.addf %43, %48 : vector<8x8xf32>
    %51 = arith.addf %49, %50 : vector<8x8xf32>
    %52 = vector.broadcast %0 : f32 to vector<8x8xf32>
    %53 = arith.addf %51, %52 : vector<8x8xf32>
    %c0_41 = arith.constant 0 : index
    %c0_42 = arith.constant 0 : index
    %54 = vector.load %arg11[%c0_41, %c0_42] : memref<8x16xf32, #tpu.memory_space<vmem>>, vector<8x16xf32>
    %cst = arith.constant dense<0.000000e+00> : vector<8x16xf32>
    %55 = tpu.matmul %53, %54, %cst {dimension_numbers = #tpu.dot_dimension_numbers<[1], [0], [0], [1], [0, 0, 1, 1], [], []>} : vector<8x8xf32>, vector<8x16xf32>, vector<8x16xf32> -> vector<8x16xf32>
    %c0_43 = arith.constant 0 : index
    %c0_44 = arith.constant 0 : index
    %56 = vector.load %arg8[%c0_43, %c0_44] : memref<16x8xf32, #tpu.memory_space<vmem>>, vector<16x8xf32>
    %cst_45 = arith.constant dense<0.000000e+00> : vector<16x16xf32>
    %57 = tpu.matmul %56, %55, %cst_45 {dimension_numbers = #tpu.dot_dimension_numbers<[1], [0], [0], [1], [0, 0, 1, 1], [], []>} : vector<16x8xf32>, vector<8x16xf32>, vector<16x16xf32> -> vector<16x16xf32>
    %c0_46 = arith.constant 0 : index
    %c1_47 = arith.constant 1 : index
    %c0_48 = arith.constant 0 : index
    %c0_49 = arith.constant 0 : index
    %58 = vector.load %arg14[%c0_46, %c1_47, %c0_48, %c0_49] : memref<1x8x16x16xf32, #tpu.memory_space<vmem>>, vector<1x1x16x16xf32>
    %59 = vector.shape_cast %58 : vector<1x1x16x16xf32> to vector<16x16xf32>
    %60 = vector.shape_cast %57 : vector<16x16xf32> to vector<1x1x16x16xf32>
    tpu.vector_store %arg14[%c0_46, %c1_47, %c0_48, %c0_49], %60 {strides = array<i32>} : memref<1x8x16x16xf32, #tpu.memory_space<vmem>>, vector<1x1x16x16xf32>,
    %c0_50 = arith.constant 0 : index
    %c0_51 = arith.constant 0 : index
    %c0_52 = arith.constant 0 : index
    %c0_53 = arith.constant 0 : index
    %61 = vector.load %arg6[%c0_50, %c0_51, %c0_52, %c0_53] : memref<1x4x5x5xf32, #tpu.memory_space<vmem>>, vector<1x1x5x5xf32>
    %62 = vector.shape_cast %61 : vector<1x1x5x5xf32> to vector<5x5xf32>
    %c0_54 = arith.constant 0 : index
    %63 = memref.load %arg2[%c0_54] : memref<4xf32, #tpu.memory_space<smem>>
    %64 = vector.broadcast %63 : f32 to vector<5x5xf32>
    %65 = arith.mulf %62, %64 : vector<5x5xf32>
    %c0_55 = arith.constant 0 : index
    %c1_56 = arith.constant 1 : index
    %c0_57 = arith.constant 0 : index
    %c0_58 = arith.constant 0 : index
    %66 = vector.load %arg6[%c0_55, %c1_56, %c0_57, %c0_58] : memref<1x4x5x5xf32, #tpu.memory_space<vmem>>, vector<1x1x5x5xf32>
    %67 = vector.shape_cast %66 : vector<1x1x5x5xf32> to vector<5x5xf32>
    %c1_59 = arith.constant 1 : index
    %68 = memref.load %arg2[%c1_59] : memref<4xf32, #tpu.memory_space<smem>>
    %69 = vector.broadcast %68 : f32 to vector<5x5xf32>
    %70 = arith.mulf %67, %69 : vector<5x5xf32>
    %c0_60 = arith.constant 0 : index
    %c2_61 = arith.constant 2 : index
    %c0_62 = arith.constant 0 : index
    %c0_63 = arith.constant 0 : index
    %71 = vector.load %arg6[%c0_60, %c2_61, %c0_62, %c0_63] : memref<1x4x5x5xf32, #tpu.memory_space<vmem>>, vector<1x1x5x5xf32>
    %72 = vector.shape_cast %71 : vector<1x1x5x5xf32> to vector<5x5xf32>
    %c2_64 = arith.constant 2 : index
    %73 = memref.load %arg2[%c2_64] : memref<4xf32, #tpu.memory_space<smem>>
    %74 = vector.broadcast %73 : f32 to vector<5x5xf32>
    %75 = arith.mulf %72, %74 : vector<5x5xf32>
    %c0_65 = arith.constant 0 : index
    %c3_66 = arith.constant 3 : index
    %c0_67 = arith.constant 0 : index
    %c0_68 = arith.constant 0 : index
    %76 = vector.load %arg6[%c0_65, %c3_66, %c0_67, %c0_68] : memref<1x4x5x5xf32, #tpu.memory_space<vmem>>, vector<1x1x5x5xf32>
    %77 = vector.shape_cast %76 : vector<1x1x5x5xf32> to vector<5x5xf32>
    %c3_69 = arith.constant 3 : index
    %78 = memref.load %arg2[%c3_69] : memref<4xf32, #tpu.memory_space<smem>>
    %79 = vector.broadcast %78 : f32 to vector<5x5xf32>
    %80 = arith.mulf %77, %79 : vector<5x5xf32>
    %81 = arith.addf %65, %70 : vector<5x5xf32>
    %82 = arith.addf %75, %80 : vector<5x5xf32>
    %83 = arith.addf %81, %82 : vector<5x5xf32>
    %84 = vector.broadcast %0 : f32 to vector<5x5xf32>
    %85 = arith.addf %83, %84 : vector<5x5xf32>
    %c0_70 = arith.constant 0 : index
    %c0_71 = arith.constant 0 : index
    %86 = vector.load %arg12[%c0_70, %c0_71] : memref<5x16xf32, #tpu.memory_space<vmem>>, vector<5x16xf32>
    %cst_72 = arith.constant dense<0.000000e+00> : vector<5x16xf32>
    %87 = tpu.matmul %85, %86, %cst_72 {dimension_numbers = #tpu.dot_dimension_numbers<[1], [0], [0], [1], [0, 0, 1, 1], [], []>} : vector<5x5xf32>, vector<5x16xf32>, vector<5x16xf32> -> vector<5x16xf32>
    %c0_73 = arith.constant 0 : index
    %c0_74 = arith.constant 0 : index
    %88 = vector.load %arg9[%c0_73, %c0_74] : memref<16x5xf32, #tpu.memory_space<vmem>>, vector<16x5xf32>
    %cst_75 = arith.constant dense<0.000000e+00> : vector<16x16xf32>
    %89 = tpu.matmul %88, %87, %cst_75 {dimension_numbers = #tpu.dot_dimension_numbers<[1], [0], [0], [1], [0, 0, 1, 1], [], []>} : vector<16x5xf32>, vector<5x16xf32>, vector<16x16xf32> -> vector<16x16xf32>
    %c0_76 = arith.constant 0 : index
    %c2_77 = arith.constant 2 : index
    %c0_78 = arith.constant 0 : index
    %c0_79 = arith.constant 0 : index
    %90 = vector.load %arg14[%c0_76, %c2_77, %c0_78, %c0_79] : memref<1x8x16x16xf32, #tpu.memory_space<vmem>>, vector<1x1x16x16xf32>
    %91 = vector.shape_cast %90 : vector<1x1x16x16xf32> to vector<16x16xf32>
    %92 = vector.shape_cast %89 : vector<16x16xf32> to vector<1x1x16x16xf32>
    tpu.vector_store %arg14[%c0_76, %c2_77, %c0_78, %c0_79], %92 {strides = array<i32>} : memref<1x8x16x16xf32, #tpu.memory_space<vmem>>, vector<1x1x16x16xf32>,
    %c0_80 = arith.constant 0 : index
    %c0_81 = arith.constant 0 : index
    %c0_82 = arith.constant 0 : index
    %c0_83 = arith.constant 0 : index
    %93 = vector.load %arg7[%c0_80, %c0_81, %c0_82, %c0_83] : memref<1x4x2x2xf32, #tpu.memory_space<vmem>>, vector<1x1x2x2xf32>
    %94 = vector.shape_cast %93 : vector<1x1x2x2xf32> to vector<2x2xf32>
    %c0_84 = arith.constant 0 : index
    %95 = memref.load %arg2[%c0_84] : memref<4xf32, #tpu.memory_space<smem>>
    %96 = vector.broadcast %95 : f32 to vector<2x2xf32>
    %97 = arith.mulf %94, %96 : vector<2x2xf32>
    %c0_85 = arith.constant 0 : index
    %c1_86 = arith.constant 1 : index
    %c0_87 = arith.constant 0 : index
    %c0_88 = arith.constant 0 : index
    %98 = vector.load %arg7[%c0_85, %c1_86, %c0_87, %c0_88] : memref<1x4x2x2xf32, #tpu.memory_space<vmem>>, vector<1x1x2x2xf32>
    %99 = vector.shape_cast %98 : vector<1x1x2x2xf32> to vector<2x2xf32>
    %c1_89 = arith.constant 1 : index
    %100 = memref.load %arg2[%c1_89] : memref<4xf32, #tpu.memory_space<smem>>
    %101 = vector.broadcast %100 : f32 to vector<2x2xf32>
    %102 = arith.mulf %99, %101 : vector<2x2xf32>
    %c0_90 = arith.constant 0 : index
    %c2_91 = arith.constant 2 : index
    %c0_92 = arith.constant 0 : index
    %c0_93 = arith.constant 0 : index
    %103 = vector.load %arg7[%c0_90, %c2_91, %c0_92, %c0_93] : memref<1x4x2x2xf32, #tpu.memory_space<vmem>>, vector<1x1x2x2xf32>
    %104 = vector.shape_cast %103 : vector<1x1x2x2xf32> to vector<2x2xf32>
    %c2_94 = arith.constant 2 : index
    %105 = memref.load %arg2[%c2_94] : memref<4xf32, #tpu.memory_space<smem>>
    %106 = vector.broadcast %105 : f32 to vector<2x2xf32>
    %107 = arith.mulf %104, %106 : vector<2x2xf32>
    %c0_95 = arith.constant 0 : index
    %c3_96 = arith.constant 3 : index
    %c0_97 = arith.constant 0 : index
    %c0_98 = arith.constant 0 : index
    %108 = vector.load %arg7[%c0_95, %c3_96, %c0_97, %c0_98] : memref<1x4x2x2xf32, #tpu.memory_space<vmem>>, vector<1x1x2x2xf32>
    %109 = vector.shape_cast %108 : vector<1x1x2x2xf32> to vector<2x2xf32>
    %c3_99 = arith.constant 3 : index
    %110 = memref.load %arg2[%c3_99] : memref<4xf32, #tpu.memory_space<smem>>
    %111 = vector.broadcast %110 : f32 to vector<2x2xf32>
    %112 = arith.mulf %109, %111 : vector<2x2xf32>
    %113 = arith.addf %97, %102 : vector<2x2xf32>
    %114 = arith.addf %107, %112 : vector<2x2xf32>
    %115 = arith.addf %113, %114 : vector<2x2xf32>
    %116 = vector.broadcast %0 : f32 to vector<2x2xf32>
    %117 = arith.addf %115, %116 : vector<2x2xf32>
    %c0_100 = arith.constant 0 : index
    %c0_101 = arith.constant 0 : index
    %118 = vector.load %arg13[%c0_100, %c0_101] : memref<2x16xf32, #tpu.memory_space<vmem>>, vector<2x16xf32>
    %cst_102 = arith.constant dense<0.000000e+00> : vector<2x16xf32>
    %119 = tpu.matmul %117, %118, %cst_102 {dimension_numbers = #tpu.dot_dimension_numbers<[1], [0], [0], [1], [0, 0, 1, 1], [], []>} : vector<2x2xf32>, vector<2x16xf32>, vector<2x16xf32> -> vector<2x16xf32>
    %c0_103 = arith.constant 0 : index
    %c0_104 = arith.constant 0 : index
    %120 = vector.load %arg10[%c0_103, %c0_104] : memref<16x2xf32, #tpu.memory_space<vmem>>, vector<16x2xf32>
    %cst_105 = arith.constant dense<0.000000e+00> : vector<16x16xf32>
    %121 = tpu.matmul %120, %119, %cst_105 {dimension_numbers = #tpu.dot_dimension_numbers<[1], [0], [0], [1], [0, 0, 1, 1], [], []>} : vector<16x2xf32>, vector<2x16xf32>, vector<16x16xf32> -> vector<16x16xf32>
    %c0_106 = arith.constant 0 : index
    %c3_107 = arith.constant 3 : index
    %c0_108 = arith.constant 0 : index
    %c0_109 = arith.constant 0 : index
    %122 = vector.load %arg14[%c0_106, %c3_107, %c0_108, %c0_109] : memref<1x8x16x16xf32, #tpu.memory_space<vmem>>, vector<1x1x16x16xf32>
    %123 = vector.shape_cast %122 : vector<1x1x16x16xf32> to vector<16x16xf32>
    %124 = vector.shape_cast %121 : vector<16x16xf32> to vector<1x1x16x16xf32>
    tpu.vector_store %arg14[%c0_106, %c3_107, %c0_108, %c0_109], %124 {strides = array<i32>} : memref<1x8x16x16xf32, #tpu.memory_space<vmem>>, vector<1x1x16x16xf32>,
    %c0_110 = arith.constant 0 : index
    %c0_111 = arith.constant 0 : index
    %c0_112 = arith.constant 0 : index
    %c0_113 = arith.constant 0 : index
    %125 = vector.load %arg4[%c0_110, %c0_111, %c0_112, %c0_113] : memref<1x4x16x16xf32, #tpu.memory_space<vmem>>, vector<1x4x16x16xf32>
    %126 = vector.shape_cast %125 : vector<1x4x16x16xf32> to vector<4x16x16xf32>
    %c0_114 = arith.constant 0 : index
    %c4 = arith.constant 4 : index
    %c0_115 = arith.constant 0 : index
    %c0_116 = arith.constant 0 : index
    %127 = vector.load %arg14[%c0_114, %c4, %c0_115, %c0_116] : memref<1x8x16x16xf32, #tpu.memory_space<vmem>>, vector<1x4x16x16xf32>
    %128 = vector.shape_cast %127 : vector<1x4x16x16xf32> to vector<4x16x16xf32>
    %129 = vector.shape_cast %126 : vector<4x16x16xf32> to vector<1x4x16x16xf32>
    tpu.vector_store %arg14[%c0_114, %c4, %c0_115, %c0_116], %129 {strides = array<i32>} : memref<1x8x16x16xf32, #tpu.memory_space<vmem>>, vector<1x4x16x16xf32>,
    return
  }
  func.func @transform_0(%arg0: i32, %arg1: i32) -> i32 {
    %c0_i32 = arith.constant 0 : i32
    %c0_i32_0 = arith.constant 0 : i32
    return %c0_i32 : i32
  }
  func.func @transform_1(%arg0: i32, %arg1: i32) -> i32 {
    %c0_i32 = arith.constant 0 : i32
    %c0_i32_0 = arith.constant 0 : i32
    return %c0_i32 : i32
  }
  func.func @transform_2(%arg0: i32, %arg1: i32) -> (i32, i32, i32, i32) {
    %c0_i32 = arith.constant 0 : i32
    %c0_i32_0 = arith.constant 0 : i32
    %c0_i32_1 = arith.constant 0 : i32
    return %arg1, %c0_i32, %arg0, %c0_i32_0 : i32, i32, i32, i32
  }
  func.func @transform_3(%arg0: i32, %arg1: i32) -> (i32, i32, i32, i32) {
    %c0_i32 = arith.constant 0 : i32
    %c0_i32_0 = arith.constant 0 : i32
    %c0_i32_1 = arith.constant 0 : i32
    %c0_i32_2 = arith.constant 0 : i32
    return %arg1, %c0_i32, %c0_i32_0, %c0_i32_1 : i32, i32, i32, i32
  }
  func.func @transform_4(%arg0: i32, %arg1: i32) -> (i32, i32, i32, i32) {
    %c0_i32 = arith.constant 0 : i32
    %c0_i32_0 = arith.constant 0 : i32
    %c0_i32_1 = arith.constant 0 : i32
    %c0_i32_2 = arith.constant 0 : i32
    return %arg1, %c0_i32, %c0_i32_0, %c0_i32_1 : i32, i32, i32, i32
  }
  func.func @transform_5(%arg0: i32, %arg1: i32) -> (i32, i32, i32, i32) {
    %c0_i32 = arith.constant 0 : i32
    %c0_i32_0 = arith.constant 0 : i32
    %c0_i32_1 = arith.constant 0 : i32
    %c0_i32_2 = arith.constant 0 : i32
    return %arg1, %c0_i32, %c0_i32_0, %c0_i32_1 : i32, i32, i32, i32
  }
  func.func @transform_6(%arg0: i32, %arg1: i32) -> (i32, i32) {
    %c0_i32 = arith.constant 0 : i32
    %c0_i32_0 = arith.constant 0 : i32
    return %arg0, %c0_i32 : i32, i32
  }
  func.func @transform_7(%arg0: i32, %arg1: i32) -> (i32, i32) {
    %c0_i32 = arith.constant 0 : i32
    %c0_i32_0 = arith.constant 0 : i32
    return %arg0, %c0_i32 : i32, i32
  }
  func.func @transform_8(%arg0: i32, %arg1: i32) -> (i32, i32) {
    %c0_i32 = arith.constant 0 : i32
    %c0_i32_0 = arith.constant 0 : i32
    return %arg0, %c0_i32 : i32, i32
  }
  func.func @transform_9(%arg0: i32, %arg1: i32) -> (i32, i32) {
    %c0_i32 = arith.constant 0 : i32
    %c0_i32_0 = arith.constant 0 : i32
    %c0_i32_1 = arith.constant 0 : i32
    return %c0_i32, %c0_i32_0 : i32, i32
  }
  func.func @transform_10(%arg0: i32, %arg1: i32) -> (i32, i32) {
    %c0_i32 = arith.constant 0 : i32
    %c0_i32_0 = arith.constant 0 : i32
    %c0_i32_1 = arith.constant 0 : i32
    return %c0_i32, %c0_i32_0 : i32, i32
  }
  func.func @transform_11(%arg0: i32, %arg1: i32) -> (i32, i32) {
    %c0_i32 = arith.constant 0 : i32
    %c0_i32_0 = arith.constant 0 : i32
    %c0_i32_1 = arith.constant 0 : i32
    return %c0_i32, %c0_i32_0 : i32, i32
  }
  func.func @transform_12(%arg0: i32, %arg1: i32) -> (i32, i32, i32, i32) {
    %c0_i32 = arith.constant 0 : i32
    %c0_i32_0 = arith.constant 0 : i32
    %c0_i32_1 = arith.constant 0 : i32
    return %arg1, %c0_i32, %arg0, %c0_i32_0 : i32, i32, i32, i32
  }
}

</mosaic_0001>

<bundles_post_ra>
// kernel: tpu_custom_call.1
= control target key start
LH: loop header
LB: loop body
LE: loop exit
PB: predicated region body
PF: predicated region fallthrough
CT: control target
= control target key end

     0   :  { %s2041_s0 = inlined_call_operand.hbm [shape: f32[4], index: 0, kind: input, shape index: {}]   ;;  %s2042_s1 = inlined_call_operand.<no memory space> [shape: f32[1], index: 1, kind: input, shape index: {}]   ;;  %s2043_s2 = inlined_call_operand.vmem [shape: f32[2,4,16,16], index: 2, kind: input, shape index: {}]   ;;  %s2044_s3 = inlined_call_operand.vmem [shape: f32[2,4,8,8], index: 3, kind: input, shape index: {}]   ;;  %s2045_s4 = inlined_call_operand.vmem [shape: f32[2,4,5,5], index: 4, kind: input, shape index: {}]   ;;  %s2046_s5 = inlined_call_operand.vmem [shape: f32[2,4,2,2], index: 5, kind: input, shape index: {}]   ;;  %s2047_s6 = inlined_call_operand.vmem [shape: f32[16,8], index: 6, kind: input, shape index: {}]   ;;  %s2048_s7 = inlined_call_operand.vmem [shape: f32[16,5], index: 7, kind: input, shape index: {}]   ;;  %s2049_s8 = inlined_call_operand.vmem [shape: f32[16,2], index: 8, kind: input, shape index: {}]   ;;  %s2050_s9 = inlined_call_operand.vmem [shape: f32[8,16], index: 9, kind: input, shape index: {}]   ;;  %s2051_s10 = inlined_call_operand.vmem [shape: f32[5,16], index: 10, kind: input, shape index: {}]   ;;  %s2052_s11 = inlined_call_operand.vmem [shape: f32[2,16], index: 11, kind: input, shape index: {}]   ;;  %s2053_s12 = inlined_call_operand.hbm [shape: f32[2,8,16,16], index: 12, kind: output, shape index: {}]  }
   0x1   :  { %2060 = sst [smem:[#allocation15_spill]] %s2041_s0 }
   0x2   :  { %2061 = sst [smem:[#allocation16_spill]] %s2050_s9 }
   0x3   :  { %17 = sst [smem:[#allocation2]] %s2042_s1 }
   0x4   :  { %18 = vsyncpa [#allocation5], 0 }
   0x5   :  { %19 = vsyncpa [#allocation4], 0 }
   0x6   :  { %21 = vsyncpa [#allocation4 + $0x1], 0  ;;  %s1762_s23 = smov 0   ;;  %s1764_s24 = smov 0  }
   0x7   :  { %s1766_s25 = smov 0   ;;  %s1768_s26 = smov 0  }
   0x8   :  { %s1770_s27 = smov 0   ;;  %s1772_s28 = smov 0  }
   0x9 LB: > { %2062 = sst [smem:[#allocation9_spill]] %s1666_s23  ;;  %s1393_s1 = sadd.s32 4294967295, %s1686_s28   ;;  %s1686_s28 = sphi %s1772_s28, %s27_s28   ;;  %s1682_s27 = sphi %s1770_s27, %s2080_s27   ;;  %s1678_s26 = sphi %s1768_s26, %s2079_s26   ;;  %s1674_s25 = sphi %s1766_s25, %s2078_s25   ;;  %s1670_s24 = sphi %s1764_s24, %s2082_s24   ;;  %s1666_s23 = sphi %s1762_s23, %s2081_s23  }
   0xa   : > { %2063 = sst [smem:[#allocation10_spill]] %s1674_s25  ;;  %s1394_s29 = sadd.s32 4294967294, %s1686_s28  }
   0xb   : > { %2064 = sst [smem:[#allocation11_spill]] %s1682_s27  ;;  %s36_s30 = sadd.s32 1, %s1682_s27 }
   0xc   : > { %s337_s13 = sadd.s32 1, %s1674_s25  ;;  %p37_p0 = scmp.ge.s32.totalorder %s36_s30, 2 }
   0xd   : > { %p347_p1 = scmp.ne.s32.totalorder %s1674_s25, %s1670_s24  ;;  %p348_p2 = scmp.eq.s32.totalorder %s1393_s1, 1 }
   0xe   : > { %p353_p3 = scmp.ne.s32.totalorder %s1670_s24, %s1666_s23  ;;  %s2084_s30 = smov (%p37_p0, %s36_s30), 0 }
   0xf   : > { %2065 = sst [smem:[#allocation12_spill]] %s2084_s30  ;;  %p1802_p4 = por %p348_p2, %p347_p1 }
  0x10   : > { %p354_p5 = scmp.eq.s32.totalorder %s1394_s29, 1  ;;  %s332_s15 = ssub.s32 %s1682_s27, %s2084_s30 }
  0x11   : > { %p1395_p6 = scmp.ge.s32.totalorder %s1686_s28, 1  ;;  %p335_p7 = scmp.eq.s32.totalorder %s332_s15, 0 }
  0x12   : > { %p1809_p8 = por %p354_p5, %p353_p3  ;;  %p361_p9 = scmp.lt.s32.totalorder %s1686_s28, 3 }
  0x13   : > { %s1815_s17 = scalar_select %p335_p7, %s1674_s25, %s337_s13  }
  0x14   : > { %s2067_s16 = scalar_select %p1809_p8, 1, 0 }
  0x15   : > { %2069 = sst [smem:[#allocation14_spill]] %s1815_s17  ;;  %p1817_p10 = pnand %p1395_p6, %p361_p9 }
  0x16   : > { %2068 = sst [smem:[#allocation13_spill]] %s2067_s16  ;;  %p1821_p11 = scmp.eq.s32.totalorder %s1393_s1, 0 }
  0x17   : > { %p1527_p12 = pneg %p1817_p10  ;;  %s2072_s0 = sld [smem:[#allocation15_spill]] }
  0x19   : > { %p1528_p13 = pnand %p1821_p11, %p1527_p12 }
  0x1b   : > { %p1593_p1 = pneg %p1528_p13 }
  0x1d   : > { %s1591_s22 = scalar_lea.hbm %s2072_s0, 16 }
  0x1e   : > { %p1592_p0 = scmp.ne.s32.totalorder %s2072_s0, %s1591_s22  ;;  %p1598_p5 = scmp.lt.u32.totalorder %s1591_s22, %s2072_s0 }
  0x20   : > { %p1594_p2 = pnand %p1593_p1, %p1592_p0 }
  0x22   : > { %p1595_p3 = pneg %p1594_p2 }
  0x24   : > { %p1600_p6 = pnand %p1598_p5, %p1595_p3 }
  0x26   : > { %1603 = shalt.err (!%p1600_p6)
}
  0x27   : > { %s1688_s30 = smov [#allocation3]   ;;  %461 = sbr.rel (%p1817_p10) target bundleno = 522 (0x20a), region = 68 }
  0x28   : > { %1530 = dma.hbm_to_smem (!%p1528_p13), %s2072_s0, 16, %s1688_s30, [#allocation5]  }
  0x2e   : > { %1657 = dma.done.wait (%p1821_p11), [#allocation5], 16  }
  0x2f   : > { %1659 = vsyncadd (%p1821_p11), [#allocation5], 4294967280 }
  0x30   : > { %467 = sfence }
  0x31   : > { %s2073_s9 = sld [smem:[#allocation16_spill]]  ;;  %s2056_s27 = sand.u32 1, %s1670_s24   ;;  %v1689_v1 = vmov 0.0   ;;  %vm1690_vm0 = vmmov 0   ;;  %vm619_vm1 = vcmask 130048   ;;  %vm646_vm2 = vcmask 64512  }
  0x32   : > { %p539_p7 = scmp.lt.s32.totalorder %s1678_s26, 1  ;;  %1491 = vmatprep.subr.mxu0 %v1689_v1  ;;  %1493 = vmatprep.mubr.msk.f32.mxu0 %vm1690_vm0, %v1689_v1  ;;  %s1403_s30 = sshll.u32 %s2056_s27, 7  ;;  %vm834_vm3 = vcmask 1044480   ;;  %vm830_vm4 = vcmask 39936   ;;  %vm1025_vm5 = vcmask 1041408   ;;  %vm1021_vm6 = vcmask 15360  }
  0x33   : > { %s585_s17 = sld [smem:[#allocation3]]  ;;  %s1861_s19 = sld [smem:[#allocation3 + $0x1]] }
  0x34   : > { %s1858_s18 = scalar_select %p539_p7, %s1678_s26, 1 }
  0x35   : > { %s1863_s22 = sld [smem:[#allocation3 + $0x2]]  ;;  %s1882_s0 = scalar_lea.vmem [#allocation6], %s1403_s30 }
  0x36   : > { %s1471_s29 = sshll.u32 %s1858_s18, 6  ;;  %s1472_s13 = sshll.u32 %s1858_s18, 5 }
  0x37   : > { %v645_v0 = vld [vmem:[%s2073_s9] sm:$0xff]  ;;  %s546_s20 = scalar_lea.vmem %s2043_s2, %s1471_s29  ;;  %s1873_s27 = scalar_lea.vmem %s2044_s3, %s1472_s13 }
  0x38   : > { %1492 = vmatpush3.msra.mxu0 %v645_v0  ;;  %v583_v2 = vld [vmem:[%s546_s20] sm:$0xff]  ;;  %v584_v3 = vld [vmem:[%s546_s20 + $0x8] sm:$0xff]  ;;  %v1412_v4 = vld [vmem:[%s546_s20 + $0x10] sm:$0xff]  ;;  %s1875_s9 = sld [smem:[#allocation3 + $0x3]]  ;;  %s1880_s23 = scalar_lea.vmem %s2045_s4, %s1472_s13 }
  0x39   : > { %1501 = vmatprep.subr.mxu0 %v1689_v1  ;;  %v586_v5 = vstv %s585_s17  ;;  %v1413_v6 = vld [vmem:[%s546_s20 + $0x18] sm:$0xff]  ;;  %v1415_v7 = vld [vmem:[%s546_s20 + $0x20] sm:$0xff]  ;;  %v1416_v8 = vld [vmem:[%s546_s20 + $0x28] sm:$0xff]  ;;  %s1474_s25 = sshll.u32 %s1858_s18, 3  ;;  %s1891_s16 = sld [smem:[#allocation2]] }
  0x3a   : > { %1458 = vst.msk [vmem:[%s1882_s0 + $0x40] sm:$0xff] %vm619_vm1, %v583_v2  ;;  %1459 = vst.msk [vmem:[%s1882_s0 + $0x48] sm:$0xff] %vm619_vm1, %v584_v3  ;;  %v587_v9 = vmul.f32 %v586_v5, %v583_v2  ;;  %v588_v10 = vmul.f32 %v586_v5, %v584_v3  ;;  %v1418_v11 = vld [vmem:[%s546_s20 + $0x30] sm:$0xff]  ;;  %v1419_v12 = vld [vmem:[%s546_s20 + $0x38] sm:$0xff]  ;;  %s1903_s18 = scalar_lea.vmem %s2046_s5, %s1474_s25  ;;  %s1691_s1 = smov [#allocation6]  }
  0x3b   : > { %1460 = vst.msk [vmem:[%s1882_s0 + $0x50] sm:$0xff] %vm619_vm1, %v1412_v4  ;;  %v622_v13 = vld [vmem:[%s1873_s27] sm:$0xff]  ;;  %1461 = vst.msk [vmem:[%s1882_s0 + $0x58] sm:$0xff] %vm619_vm1, %v1413_v6  ;;  %v593_v14 = vstv %s1861_s19  ;;  %s1608_s15 = sshll.u32 %s1691_s1, 4  ;;  %s1609_s15 = int_to_ptr.vmem [resolvable:$false] %s1608_s15 }
  0x3c   : > { %1462 = vst.msk [vmem:[%s1882_s0 + $0x60] sm:$0xff] %vm619_vm1, %v1415_v7  ;;  %1463 = vst.msk [vmem:[%s1882_s0 + $0x68] sm:$0xff] %vm619_vm1, %v1416_v8  ;;  %v600_v15 = vstv %s1863_s22  ;;  %v625_v16 = vmul.f32 %v622_v13, %v586_v5  ;;  %v1421_v17 = vld [vmem:[%s1873_s27 + $0x8] sm:$0xff]  ;;  %v594_v19 = vmul.f32 %v1412_v4, %v593_v14  ;;  %v595_v20 = vmul.f32 %v1413_v6, %v593_v14  ;;  %s1610_s20 = scalar_lea.vmem %s1609_s15, 4096 }
  0x3d   : > { %v1423_v18 = vld [vmem:[%s1873_s27 + $0x10] sm:$0xff]  ;;  %1464 = vst.msk [vmem:[%s1882_s0 + $0x70] sm:$0xff] %vm619_vm1, %v1418_v11  ;;  %1465 = vst.msk [vmem:[%s1882_s0 + $0x78] sm:$0xff] %vm619_vm1, %v1419_v12  ;;  %v601_v21 = vmul.f32 %v1415_v7, %v600_v15  ;;  %v602_v22 = vmul.f32 %v1416_v8, %v600_v15  ;;  %v1425_v23 = vld [vmem:[%s1873_s27 + $0x18] sm:$0xff]  ;;  %v630_v26 = vmul.f32 %v1421_v17, %v593_v14 }
  0x3e   : > { %v806_v24 = vld [vmem:[%s1880_s23] sm:$0x1f]  ;;  %v1432_v25 = vld [vmem:[%s1880_s23 + $0x8] sm:$0x1f]  ;;  %v635_v27 = vmul.f32 %v1423_v18, %v600_v15  ;;  %v1434_v30 = vld [vmem:[%s1880_s23 + $0x10] sm:$0x1f]  ;;  %v607_v33 = vstv %s1875_s9  ;;  %v610_v34 = vadd.f32 %v594_v19, %v587_v9  ;;  %v611_v35 = vadd.f32 %v595_v20, %v588_v10 }
  0x3f   : > { %v809_v28 = vmul.f32 %v806_v24, %v586_v5  ;;  %v814_v29 = vmul.f32 %v1432_v25, %v593_v14  ;;  %v1436_v31 = vld [vmem:[%s1880_s23 + $0x18] sm:$0x1f]  ;;  %v997_v32 = vld [vmem:[%s1903_s18] sm:$0x3]  ;;  %v819_v36 = vmul.f32 %v1434_v30, %v600_v15  ;;  %v1445_v37 = vld [vmem:[%s1903_s18 + $0x2] sm:$0x3]  ;;  %v608_v39 = vmul.f32 %v1418_v11, %v607_v33 }
  0x40   : > { %v1447_v38 = vld [vmem:[%s1903_s18 + $0x4] sm:$0x3]  ;;  %v609_v40 = vmul.f32 %v1419_v12, %v607_v33  ;;  %v640_v41 = vmul.f32 %v1425_v23, %v607_v33  ;;  %v641_v42 = vadd.f32 %v630_v26, %v625_v16  ;;  %v1449_v43 = vld [vmem:[%s1903_s18 + $0x6] sm:$0x3]  ;;  %v824_v44 = vmul.f32 %v1436_v31, %v607_v33  ;;  %v1020_v4 = vld [vmem:[%s2052_s11] sm:$0x3] }
  0x41   : > { %v825_v45 = vadd.f32 %v814_v29, %v809_v28  ;;  %v1000_v46 = vmul.f32 %v997_v32, %v586_v5  ;;  %v1005_v47 = vmul.f32 %v1445_v37, %v593_v14  ;;  %v612_v48 = vadd.f32 %v608_v39, %v601_v21  ;;  %v829_v0 = vld [vmem:[%s2051_s10] sm:$0x1f]  ;;  %v721_v8 = vld [vmem:[%s2047_s6 + $0x8] sm:$0xff]  ;;  %s1475_s9 = sshll.u32 %s1678_s26, 11  ;;  %s1221_s23 = sshll.u32 %s1882_s0, 4  ;;  %s1987_s23 = int_to_ptr.vmem [resolvable:$true] %s1221_s23 }
  0x42   : > { %v613_v49 = vadd.f32 %v609_v40, %v602_v22  ;;  %v642_v50 = vadd.f32 %v640_v41, %v635_v27  ;;  %v1010_v51 = vmul.f32 %v1447_v38, %v600_v15  ;;  %v616_v52 = vstv %s1891_s16  ;;  %v720_v6 = vld [vmem:[%s2047_s6] sm:$0xff]  ;;  %v909_v11 = vld [vmem:[%s2048_s7 + $0x8] sm:$0xff]  ;;  %s1985_s22 = scalar_lea.hbm %s2053_s12, %s1475_s9  ;;  %s2074_s26 = sand.u32 1, %s1670_s24  }
  0x43   : > { %v826_v53 = vadd.f32 %v824_v44, %v819_v36  ;;  %v1015_v54 = vmul.f32 %v1449_v43, %v607_v33  ;;  %v614_v55 = vadd.f32 %v612_v48, %v610_v34  ;;  %v1016_v58 = vadd.f32 %v1005_v47, %v1000_v46  ;;  %1498 = vmatprep.mubr.msk.f32.mxu1 %vm646_vm2, %v720_v6  ;;  %v1099_v13 = vld [vmem:[%s2049_s8] sm:$0xff]  ;;  %v1100_v15 = vld [vmem:[%s2049_s8 + $0x8] sm:$0xff]  ;;  %s1995_s29 = scalar_lea.sflag [#allocation4], %s2074_s26  ;;  %s1604_s13 = scalar_lea.vmem %s1987_s23, 2048 }
  0x44   : > { %v615_v56 = vadd.f32 %v613_v49, %v611_v35  ;;  %v643_v57 = vadd.f32 %v642_v50, %v641_v42  ;;  %p1605_p9 = scmp.ne.s32.totalorder %s1987_s23, %s1604_s13  ;;  %p1611_p12 = scmp.lt.s32.totalorder %s1987_s23, %s1609_s15 }
  0x45   : > { %v827_v59 = vadd.f32 %v826_v53, %v825_v45  ;;  %v1017_v60 = vadd.f32 %v1015_v54, %v1010_v51  ;;  %v617_v61 = vadd.f32 %v616_v52, %v614_v55  ;;  %p1612_p13 = scmp.lt.s32.totalorder %s1610_s20, %s1604_s13 }
  0x46   : > { %v618_v62 = vadd.f32 %v616_v52, %v615_v56  ;;  %v644_v63 = vadd.f32 %v643_v57, %v616_v52  ;;  %p1606_p10 = pnand %p1605_p9, %p1802_p4 }
  0x47   : > { %620 = vst.msk [vmem:[%s1882_s0] sm:$0xff] %vm619_vm1, %v617_v61  ;;  %v828_v2 = vadd.f32 %v827_v59, %v616_v52  ;;  %v1018_v3 = vadd.f32 %v1017_v60, %v1016_v58  ;;  %p1613_p0 = por %p1612_p13, %p1611_p12 }
  0x48   : > { %621 = vst.msk [vmem:[%s1882_s0 + $0x8] sm:$0xff] %vm619_vm1, %v618_v62  ;;  %1494 = vmatmul.mubr.msk.f32.vlgmr.msra.gmra.mrb[0].mxu0 %vm646_vm2, %v644_v63  ;;  %p1607_p11 = pneg %p1606_p10 }
  0x49   : > { %1502 = vmatpush3.msk.msra.mxu0 %vm834_vm3, %v829_v0  ;;  %1503 = vmatprep.mubr.msk.f32.mxu0 %vm1690_vm0, %v1689_v1  ;;  %v1019_v5 = vadd.f32 %v1018_v3, %v616_v52 }
  0x4a   : > { %1511 = vmatprep.subr.mxu0 %v1689_v1  ;;  %p1614_p1 = pnand %p1613_p0, %p1607_p11 }
  0x4c   : > { %1504 = vmatmul.mubr.msk.f32.vlgmr.msra.gmra.mrb[2].mxu0 %vm830_vm4, %v828_v2 }
  0x4d   : > { %1512 = vmatpush3.msk.msra.mxu0 %vm1025_vm5, %v1020_v4  ;;  %1513 = vmatprep.mubr.msk.f32.mxu0 %vm1690_vm0, %v1689_v1  ;;  %v908_v1 = vld [vmem:[%s2048_s7] sm:$0xff] }
  0x50   : > { %1514 = vmatmul.mubr.msk.f32.vlgmr.msra.gmra.mrb[4].mxu0 %vm1021_vm6, %v1019_v5 }
 0x11b   : > { %v716_v7 = vpop.f32.mrb[0].mxu0 }
 0x11c   : > { %v1495_v9 = vpop.f32.mrb[1].mxu0  ;;  %1496 = vmatprep.subr.mxu1 %v716_v7 }
 0x11d   : > { %1497 = vmatpush3.msra.mxu1 %v716_v7 }
 0x11e   : > { %1499 = vmatmul.mubr.msk.f32.vlgmr.msra.gmra.mrb[0].mxu1 %vm646_vm2, %v721_v8 }
 0x11f   : > { %v904_v10 = vpop.f32.mrb[2].mxu0  ;;  %1508 = vmatprep.mubr.msk.f32.mxu1 %vm830_vm4, %v908_v1 }
 0x120   : > { %v1505_v12 = vpop.f32.mrb[3].mxu0  ;;  %1506 = vmatprep.subr.msk.mxu1 %vm834_vm3, %v904_v10 }
 0x121   : > { %1507 = vmatpush3.msk.msra.mxu1 %vm834_vm3, %v904_v10 }
 0x122   : > { %1509 = vmatmul.mubr.msk.f32.vlgmr.msra.gmra.mrb[2].mxu1 %vm830_vm4, %v909_v11 }
 0x123   : > { %v1095_v14 = vpop.f32.mrb[4].mxu0  ;;  %1518 = vmatprep.mubr.msk.f32.mxu1 %vm1021_vm6, %v1099_v13 }
 0x124   : > { %v1515_v16 = vpop.f32.mrb[5].mxu0  ;;  %1516 = vmatprep.subr.msk.mxu1 %vm1025_vm5, %v1095_v14 }
 0x125   : > { %1517 = vmatpush3.msk.msra.mxu1 %vm1025_vm5, %v1095_v14 }
 0x126   : > { %1519 = vmatmul.mubr.msk.f32.vlgmr.msra.gmra.mrb[4].mxu1 %vm1021_vm6, %v1100_v15 }
 0x1f1   : > { %v1500_v17 = vpop.f32.mrb[0].mxu1 }
 0x1f2   : > { %1431 = vst.msk [vmem:[%s1882_s0 + $0x18] sm:$0xff] %vm619_vm1, %v1500_v17  ;;  %v794_v18 = vpop.f32.mrb[1].mxu1 }
 0x1f3   : > { %1430 = vst.msk [vmem:[%s1882_s0 + $0x10] sm:$0xff] %vm619_vm1, %v794_v18 }
 0x1f5   : > { %v1510_v19 = vpop.f32.mrb[2].mxu1 }
 0x1f6   : > { %1444 = vst.msk [vmem:[%s1882_s0 + $0x28] sm:$0xff] %vm619_vm1, %v1510_v19  ;;  %v985_v20 = vpop.f32.mrb[3].mxu1 }
 0x1f7   : > { %1443 = vst.msk [vmem:[%s1882_s0 + $0x20] sm:$0xff] %vm619_vm1, %v985_v20 }
 0x1f9   : > { %v1520_v21 = vpop.f32.mrb[4].mxu1 }
 0x1fa   : > { %1457 = vst.msk [vmem:[%s1882_s0 + $0x38] sm:$0xff] %vm619_vm1, %v1520_v21  ;;  %v1176_v22 = vpop.f32.mrb[5].mxu1 }
 0x1fb   : > { %1456 = vst.msk [vmem:[%s1882_s0 + $0x30] sm:$0xff] %vm619_vm1, %v1176_v22 }
 0x1fc   : > { %1617 = shalt.err (!%p1614_p1)
}
 0x1fd   : > { %s1618_s0 = scalar_lea.hbm %s1985_s22, 2048  ;;  %s1622_s16 = scalar_lea.hbm %s2053_s12, 4096 }
 0x1fe   : > { %p1619_p2 = scmp.ne.s32.totalorder %s1985_s22, %s1618_s0  ;;  %p1623_p6 = scmp.lt.u32.totalorder %s1985_s22, %s2053_s12 }
 0x1ff   : > { %p1624_p7 = scmp.lt.u32.totalorder %s1622_s16, %s1618_s0  ;;  %p1626_p10 = scmp.lt.u32.totalorder %s1618_s0, %s1985_s22 }
 0x200   : > { %p1620_p3 = pnand %p1619_p2, %p1802_p4 }
 0x201   : > { %p1625_p9 = por %p1624_p7, %p1623_p6 }
 0x202   : > { %p1621_p5 = pneg %p1620_p3 }
 0x203   : > { %p1627_p11 = por %p1626_p10, %p1625_p9 }
 0x205   : > { %p1628_p12 = pnand %p1627_p11, %p1621_p5 }
 0x207   : > { %1631 = shalt.err (!%p1628_p12)
}
 0x208   : > { %s1692_s18 = smov 128   ;;  %s1693_s9 = smov 8  }
 0x209   : > { %1525 = dma.vmem_to_hbm [thread:$0]  (%p1802_p4), %s1987_s23, 2048, %s1985_s22, %s1995_s29, %s1692_s18, %s1692_s18, %s1693_s9  }
 0x20a PF: > { %s2075_s27 = sld [smem:[#allocation9_spill]]  ;;  %p1537_p13 = scmp.ge.s32.totalorder %s1686_s28, 2 }
 0x20c   : > { %p1532_p0 = pnand %p1537_p13, %p1809_p8 }
 0x210   : > { %s1236_s26 = sand.u32 1, %s2075_s27  }
 0x211   : > { %s1237_s13 = scalar_lea.sflag [#allocation4], %s1236_s26 }
 0x212   : > { %1661 = dma.done.wait (!%p1532_p0), %s1237_s13, 2048  }
 0x213   : > { %1663 = vsyncadd (!%p1532_p0), %s1237_s13, 4294965248  ;;  %s27_s28 = sadd.s32 1, %s1686_s28   ;;  %s2077_s1 = sld [smem:[#allocation10_spill]] }
 0x214   : > { %p24_p1 = scmp.ge.s32.totalorder %s27_s28, 4   ;;  %s2078_s25 = sld [smem:[#allocation14_spill]] }
 0x215   : > { %s2079_s26 = sld [smem:[#allocation11_spill]]  ;;  %s2080_s27 = sld [smem:[#allocation12_spill]] }
 0x216   : > { %s2081_s23 = smov %s1670_s24  ;;  %26 = sbr.rel (!%p24_p1) target bundleno = 9 (0x9), region = 142 }
 0x219   : > { %s2082_s24 = smov %s2077_s1 }
 0x21d   :  { %1242 = vsyncpa [#allocation4], 1 }
 0x21e   :  { %1244 = vsyncpa [#allocation4 + $0x1], 1 }
 0x21f   :  { %1245 = vsyncpa [#allocation5], 1 }
 0x220   :  { %1247 = vsyncpa [#allocation5 + $0x1], 1 }

</bundles_post_ra>
